<compile_context>
chip_gen: v7x
topology: tpu7x:2x2x1
jax: 0.10.0
libtpu: 0.0.40
codegen_flags: <defaults>
</compile_context>

<pallas_src>
import functools

import jax
import jax.numpy as jnp
from jax.experimental import pallas as pl
from jax.experimental.pallas import tpu as pltpu

_IGNORE_INDEX = -100  # nn.CrossEntropyLoss default


def _vmem_capacity_bytes():
    """Best-effort physical VMEM query; falls back to the smallest (v7x) size."""
    try:
        info = pltpu.get_tpu_info()
        for attr in ("vmem_capacity_bytes", "vmem_bytes", "vmem_capacity"):
            v = getattr(info, attr, None)
            if v:
                return int(v)
    except Exception:
        pass
    return 64 * 1024 * 1024  # conservative: v7x has 64 MiB per TensorCore


def _pick_tile_hw(hw, c, in_itemsize, working_budget_bytes):
    """Largest lane tile whose full per-step VMEM working set fits the budget.

    Per lane-column bytes:
      2 * c * in_itemsize   double-buffered logits block
      3 * c * 4             f32 temporaries in the exp / logsumexp path
      c * 4                 cached int32 class-iota scratch
      2 * 4                 double-buffered int32 target block
      4 * 4                 resident f32 loss / count accumulator rows
    """
    per_col = c * (2 * in_itemsize + 3 * 4 + 4) + 2 * 4 + 4 * 4
    t = int(working_budget_bytes // per_col)
    if t >= hw:
        return hw
    return max(128, (t // 128) * 128)


def _ce_kernel(x_ref, t_ref, loss_ref, cnt_ref, cls_ref, *,
               hw, tile_hw, tiles_per_split, needs_mask):
    q = pl.program_id(1)   # spatial split index (megacore "parallel" axis)
    j = pl.program_id(2)   # tile index within the split ("arbitrary" axis)

    @pl.when(j == 0)
    def _():
        loss_ref[...] = jnp.zeros_like(loss_ref)
        cnt_ref[...] = jnp.zeros_like(cnt_ref)
        # Build the class iota once per output block; later steps just vld it.
        cls_ref[...] = jax.lax.broadcasted_iota(jnp.int32, cls_ref.shape, 0)

    x = x_ref[0]                        # (C, T) in the input dtype (bf16 stays bf16)
    t = t_ref[0]                        # (1, T) int32 targets

    # max and the one-hot "pick" are exact in the input dtype.
    m = jnp.max(x, axis=0, keepdims=True)                               # (1, T)
    onehot = cls_ref[...] == t                                          # (C, T)
    picked = jnp.sum(jnp.where(onehot, x, 0.0), axis=0, keepdims=True)  # (1, T)

    # f32 only inside the exp / sum-of-exp path (numerically stable logsumexp).
    m32 = m.astype(jnp.float32)
    ex = jnp.exp(x.astype(jnp.float32) - m32)                           # (C, T)
    lse = m32 + jnp.log(jnp.sum(ex, axis=0, keepdims=True))             # (1, T)

    valid = t != _IGNORE_INDEX                                          # (1, T)
    if needs_mask:  # static: only emitted when HW % TILE_HW != 0
        col = ((q * tiles_per_split + j) * tile_hw
               + jax.lax.broadcasted_iota(jnp.int32, t.shape, 1))
        valid = valid & (col < hw)

    # Select (not multiply) so NaN/Inf from padded block regions cannot leak.
    loss = jnp.where(valid, lse - picked.astype(jnp.float32), 0.0)      # (1, T)

    # Lane-dense VPU accumulation; cross-lane reduce deferred to the wrapper.
    loss_ref[0, 0] += loss
    cnt_ref[0, 0] += valid.astype(jnp.float32)


def cross_entropy_pallas(logits, target):
    """nn.CrossEntropyLoss()(input, target); input (N,C,*spatial), target (N,*spatial)."""
    n, c = logits.shape[0], logits.shape[1]
    spatial = logits.shape[2:]
    hw = 1
    for s in spatial:
        hw *= s

    # Free reshapes only: no transpose, no dtype copy of the logits in HBM.
    x3 = logits.reshape(n, c, hw)
    t3 = target.reshape(n, 1, hw).astype(jnp.int32)

    in_item = jnp.dtype(logits.dtype).itemsize
    vmem_cap = _vmem_capacity_bytes()
    big_vmem = vmem_cap >= 100 * 1024 * 1024          # v5e / v6e (128 MiB parts)
    vmem_limit = (96 if big_vmem else 48) * 1024 * 1024
    working_budget = (64 if big_vmem else 30) * 1024 * 1024

    tile_hw = _pick_tile_hw(hw, c, in_item, working_budget)
    n_hw = pl.cdiv(hw, tile_hw)
    # Spatial megacore split (v7x): race-free because each (batch, split) pair
    # owns its own accumulator block.  Only used when the tile count is even.
    n_splits = 2 if (n_hw >= 2 and n_hw % 2 == 0) else 1
    tiles_per_split = n_hw // n_splits
    needs_mask = (hw % tile_hw) != 0

    kernel = functools.partial(
        _ce_kernel, hw=hw, tile_hw=tile_hw,
        tiles_per_split=tiles_per_split, needs_mask=needs_mask,
    )

    loss_part, cnt_part = pl.pallas_call(
        kernel,
        out_shape=(
            jax.ShapeDtypeStruct((n, n_splits, 1, tile_hw), jnp.float32),
            jax.ShapeDtypeStruct((n, n_splits, 1, tile_hw), jnp.float32),
        ),
        grid_spec=pltpu.PrefetchScalarGridSpec(
            num_scalar_prefetch=0,
            grid=(n, n_splits, tiles_per_split),
            in_specs=[
                pl.BlockSpec((1, c, tile_hw),
                             lambda p, q, j: (p, 0, q * tiles_per_split + j)),
                pl.BlockSpec((1, 1, tile_hw),
                             lambda p, q, j: (p, 0, q * tiles_per_split + j)),
            ],
            out_specs=[
                pl.BlockSpec((1, 1, 1, tile_hw), lambda p, q, j: (p, q, 0, 0)),
                pl.BlockSpec((1, 1, 1, tile_hw), lambda p, q, j: (p, q, 0, 0)),
            ],
            scratch_shapes=[pltpu.VMEM((c, tile_hw), jnp.int32)],
        ),
        compiler_params=pltpu.CompilerParams(
            dimension_semantics=("parallel", "parallel", "arbitrary"),
            vmem_limit_bytes=vmem_limit,
        ),
    )(x3, t3)

    # Final cross-lane reduce + mean over non-ignored targets.
    # NOTE: if every target == ignore_index this is 0/0 -> NaN, matching torch.
    return jnp.sum(loss_part) / jnp.sum(cnt_part)


def _reference_ce(logits_nchw, target_nhw):
    """Pure-JAX reference matching torch.nn.CrossEntropyLoss() defaults."""
    n, c = logits_nchw.shape[0], logits_nchw.shape[1]
    x = jnp.moveaxis(logits_nchw, 1, -1).reshape(-1, c).astype(jnp.float32)
    t = target_nhw.reshape(-1)
    lse = jax.scipy.special.logsumexp(x, axis=-1)
    picked = jnp.take_along_axis(x, jnp.clip(t, 0, c - 1)[:, None], axis=-1)[:, 0]
    valid = t != _IGNORE_INDEX
    losses = jnp.where(valid, lse - picked, 0.0)
    return jnp.sum(losses) / jnp.sum(valid.astype(jnp.float32))


if __name__ == "__main__":
    key = jax.random.PRNGKey(0)
    k1, k2 = jax.random.split(key)

    N, C, H, W = 2, 4, 16, 16
    logits = jax.random.normal(k1, (N, C, H, W), dtype=jnp.float32)
    target = jax.random.randint(k2, (N, H, W), minval=0, maxval=C, dtype=jnp.int32)
    # Exercise ignore_index handling on a few positions.
    target = target.at[0, 0, :3].set(_IGNORE_INDEX)

    loss = cross_entropy_pallas(logits, target)
    loss = jax.block_until_ready(loss)

    ref = _reference_ce(logits, target)
    assert jnp.isfinite(loss), loss
    assert jnp.allclose(loss, ref, atol=1e-4, rtol=1e-4), (loss, ref)

    print("KERNEL_OK")
</pallas_src>

<mosaic_0001>
module attributes {stable_mosaic.version = 11 : i64} {
  func.func @_ce_kernel(%arg0: i32, %arg1: i32, %arg2: i32, %arg3: memref<1x4x256xf32, #tpu.memory_space<vmem>>, %arg4: memref<1x1x256xi32, #tpu.memory_space<vmem>>, %arg5: memref<1x1x1x256xf32, #tpu.memory_space<vmem>>, %arg6: memref<1x1x1x256xf32, #tpu.memory_space<vmem>>, %arg7: memref<4x256xi32, #tpu.memory_space<vmem>>) attributes {dimension_semantics = [#tpu.dimension_semantics<parallel>, #tpu.dimension_semantics<parallel>, #tpu.dimension_semantics<arbitrary>], iteration_bounds = array<i64: 2, 1, 1>, scalar_prefetch = 0 : i64, scratch_operands = 1 : i64, tpu.core_type = #tpu.core_type<tc>, window_params = [{transform_indices = @transform_0, window_bounds = array<i64: 1, 4, 256>}, {transform_indices = @transform_1, window_bounds = array<i64: 1, 1, 256>}, {transform_indices = @transform_2, window_bounds = array<i64: 1, 1, 1, 256>}, {transform_indices = @transform_3, window_bounds = array<i64: 1, 1, 1, 256>}]} {
    %c0_i32 = arith.constant 0 : i32
    %0 = arith.cmpi eq, %arg2, %c0_i32 : i32
    %1 = arith.extui %0 : i1 to i32
    %c0_i32_0 = arith.constant 0 : i32
    %2 = arith.cmpi ne, %1, %c0_i32_0 : i32
    scf.if %2 {
      %cst_28 = arith.constant 0.000000e+00 : f32
      %42 = vector.broadcast %cst_28 : f32 to vector<1x1x1x256xf32>
      %c0_29 = arith.constant 0 : index
      %c0_30 = arith.constant 0 : index
      %c0_31 = arith.constant 0 : index
      %c0_32 = arith.constant 0 : index
      %43 = vector.load %arg5[%c0_29, %c0_30, %c0_31, %c0_32] : memref<1x1x1x256xf32, #tpu.memory_space<vmem>>, vector<1x1x1x256xf32>
      tpu.vector_store %arg5[%c0_29, %c0_30, %c0_31, %c0_32], %42 {strides = array<i32>} : memref<1x1x1x256xf32, #tpu.memory_space<vmem>>, vector<1x1x1x256xf32>,
      %cst_33 = arith.constant 0.000000e+00 : f32
      %44 = vector.broadcast %cst_33 : f32 to vector<1x1x1x256xf32>
      %c0_34 = arith.constant 0 : index
      %c0_35 = arith.constant 0 : index
      %c0_36 = arith.constant 0 : index
      %c0_37 = arith.constant 0 : index
      %45 = vector.load %arg6[%c0_34, %c0_35, %c0_36, %c0_37] : memref<1x1x1x256xf32, #tpu.memory_space<vmem>>, vector<1x1x1x256xf32>
      tpu.vector_store %arg6[%c0_34, %c0_35, %c0_36, %c0_37], %44 {strides = array<i32>} : memref<1x1x1x256xf32, #tpu.memory_space<vmem>>, vector<1x1x1x256xf32>,
      %46 = tpu.iota {dimensions = array<i32: 0>} : vector<4x256xi32>
      %c0_38 = arith.constant 0 : index
      %c0_39 = arith.constant 0 : index
      %47 = vector.load %arg7[%c0_38, %c0_39] : memref<4x256xi32, #tpu.memory_space<vmem>>, vector<4x256xi32>
      tpu.vector_store %arg7[%c0_38, %c0_39], %46 {strides = array<i32>} : memref<4x256xi32, #tpu.memory_space<vmem>>, vector<4x256xi32>,
    } else {
    }
    %c0 = arith.constant 0 : index
    %c0_1 = arith.constant 0 : index
    %c0_2 = arith.constant 0 : index
    %3 = vector.load %arg3[%c0, %c0_1, %c0_2] : memref<1x4x256xf32, #tpu.memory_space<vmem>>, vector<1x4x256xf32>
    %4 = vector.shape_cast %3 : vector<1x4x256xf32> to vector<4x256xf32>
    %c0_3 = arith.constant 0 : index
    %c0_4 = arith.constant 0 : index
    %c0_5 = arith.constant 0 : index
    %5 = vector.load %arg4[%c0_3, %c0_4, %c0_5] : memref<1x1x256xi32, #tpu.memory_space<vmem>>, vector<1x1x256xi32>
    %6 = vector.shape_cast %5 : vector<1x1x256xi32> to vector<1x256xi32>
    %cst = arith.constant dense<0xFF800000> : vector<256xf32>
    %7 = vector.multi_reduction <maximumf>, %4, %cst [0] : vector<4x256xf32> to vector<256xf32>
    %8 = vector.shape_cast %7 : vector<256xf32> to vector<1x256xf32>
    %c0_6 = arith.constant 0 : index
    %c0_7 = arith.constant 0 : index
    %9 = vector.load %arg7[%c0_6, %c0_7] : memref<4x256xi32, #tpu.memory_space<vmem>>, vector<4x256xi32>
    %10 = vector.broadcast %6 : vector<1x256xi32> to vector<4x256xi32>
    %11 = arith.cmpi eq, %9, %10 : vector<4x256xi32>
    %cst_8 = arith.constant 0.000000e+00 : f32
    %12 = vector.broadcast %cst_8 : f32 to vector<4x256xf32>
    %13 = arith.select %11, %4, %12 : vector<4x256xi1>, vector<4x256xf32>
    %cst_9 = arith.constant dense<0.000000e+00> : vector<256xf32>
    %14 = vector.multi_reduction <add>, %13, %cst_9 [0] : vector<4x256xf32> to vector<256xf32>
    %15 = vector.shape_cast %14 : vector<256xf32> to vector<1x256xf32>
    %16 = vector.broadcast %8 : vector<1x256xf32> to vector<4x256xf32>
    %17 = arith.subf %4, %16 : vector<4x256xf32>
    %18 = math.exp %17 : vector<4x256xf32>
    %cst_10 = arith.constant dense<0.000000e+00> : vector<256xf32>
    %19 = vector.multi_reduction <add>, %18, %cst_10 [0] : vector<4x256xf32> to vector<256xf32>
    %20 = vector.shape_cast %19 : vector<256xf32> to vector<1x256xf32>
    %21 = math.log %20 : vector<1x256xf32>
    %22 = arith.addf %8, %21 : vector<1x256xf32>
    %c-100_i32 = arith.constant -100 : i32
    %23 = vector.broadcast %c-100_i32 : i32 to vector<1x256xi32>
    %24 = arith.cmpi ne, %6, %23 : vector<1x256xi32>
    %25 = arith.subf %22, %15 : vector<1x256xf32>
    %cst_11 = arith.constant 0.000000e+00 : f32
    %26 = vector.broadcast %cst_11 : f32 to vector<1x256xf32>
    %27 = arith.select %24, %25, %26 : vector<1x256xi1>, vector<1x256xf32>
    %c0_12 = arith.constant 0 : index
    %c0_13 = arith.constant 0 : index
    %c0_14 = arith.constant 0 : index
    %c0_15 = arith.constant 0 : index
    %28 = vector.load %arg5[%c0_12, %c0_13, %c0_14, %c0_15] : memref<1x1x1x256xf32, #tpu.memory_space<vmem>>, vector<1x1x1x256xf32>
    %29 = vector.shape_cast %28 : vector<1x1x1x256xf32> to vector<1x256xf32>
    %30 = arith.addf %29, %27 : vector<1x256xf32>
    %c0_16 = arith.constant 0 : index
    %c0_17 = arith.constant 0 : index
    %c0_18 = arith.constant 0 : index
    %c0_19 = arith.constant 0 : index
    %31 = vector.load %arg5[%c0_16, %c0_17, %c0_18, %c0_19] : memref<1x1x1x256xf32, #tpu.memory_space<vmem>>, vector<1x1x1x256xf32>
    %32 = vector.shape_cast %31 : vector<1x1x1x256xf32> to vector<1x256xf32>
    %33 = vector.shape_cast %30 : vector<1x256xf32> to vector<1x1x1x256xf32>
    tpu.vector_store %arg5[%c0_16, %c0_17, %c0_18, %c0_19], %33 {strides = array<i32>} : memref<1x1x1x256xf32, #tpu.memory_space<vmem>>, vector<1x1x1x256xf32>,
    %c0_20 = arith.constant 0 : index
    %c0_21 = arith.constant 0 : index
    %c0_22 = arith.constant 0 : index
    %c0_23 = arith.constant 0 : index
    %34 = vector.load %arg6[%c0_20, %c0_21, %c0_22, %c0_23] : memref<1x1x1x256xf32, #tpu.memory_space<vmem>>, vector<1x1x1x256xf32>
    %35 = vector.shape_cast %34 : vector<1x1x1x256xf32> to vector<1x256xf32>
    %36 = arith.extui %24 : vector<1x256xi1> to vector<1x256xi32>
    %37 = arith.sitofp %36 : vector<1x256xi32> to vector<1x256xf32>
    %38 = arith.addf %35, %37 : vector<1x256xf32>
    %c0_24 = arith.constant 0 : index
    %c0_25 = arith.constant 0 : index
    %c0_26 = arith.constant 0 : index
    %c0_27 = arith.constant 0 : index
    %39 = vector.load %arg6[%c0_24, %c0_25, %c0_26, %c0_27] : memref<1x1x1x256xf32, #tpu.memory_space<vmem>>, vector<1x1x1x256xf32>
    %40 = vector.shape_cast %39 : vector<1x1x1x256xf32> to vector<1x256xf32>
    %41 = vector.shape_cast %38 : vector<1x256xf32> to vector<1x1x1x256xf32>
    tpu.vector_store %arg6[%c0_24, %c0_25, %c0_26, %c0_27], %41 {strides = array<i32>} : memref<1x1x1x256xf32, #tpu.memory_space<vmem>>, vector<1x1x1x256xf32>,
    return
  }
  func.func @transform_0(%arg0: i32, %arg1: i32, %arg2: i32) -> (i32, i32, i32) {
    %c1_i32 = arith.constant 1 : i32
    %0 = arith.muli %arg1, %c1_i32 : i32
    %1 = arith.addi %0, %arg2 : i32
    %c0_i32 = arith.constant 0 : i32
    %c0_i32_0 = arith.constant 0 : i32
    return %arg0, %c0_i32, %1 : i32, i32, i32
  }
  func.func @transform_1(%arg0: i32, %arg1: i32, %arg2: i32) -> (i32, i32, i32) {
    %c1_i32 = arith.constant 1 : i32
    %0 = arith.muli %arg1, %c1_i32 : i32
    %1 = arith.addi %0, %arg2 : i32
    %c0_i32 = arith.constant 0 : i32
    %c0_i32_0 = arith.constant 0 : i32
    return %arg0, %c0_i32, %1 : i32, i32, i32
  }
  func.func @transform_2(%arg0: i32, %arg1: i32, %arg2: i32) -> (i32, i32, i32, i32) {
    %c0_i32 = arith.constant 0 : i32
    %c0_i32_0 = arith.constant 0 : i32
    %c0_i32_1 = arith.constant 0 : i32
    return %arg0, %arg1, %c0_i32, %c0_i32_0 : i32, i32, i32, i32
  }
  func.func @transform_3(%arg0: i32, %arg1: i32, %arg2: i32) -> (i32, i32, i32, i32) {
    %c0_i32 = arith.constant 0 : i32
    %c0_i32_0 = arith.constant 0 : i32
    %c0_i32_1 = arith.constant 0 : i32
    return %arg0, %arg1, %c0_i32, %c0_i32_0 : i32, i32, i32, i32
  }
}

</mosaic_0001>

<bundles_post_ra>
// kernel: tpu_custom_call.1
= control target key start
LH: loop header
LB: loop body
LE: loop exit
PB: predicated region body
PF: predicated region fallthrough
CT: control target
= control target key end

     0   :  { %9 = vsyncpa [#allocation4], 0  ;;  %s1210_s0 = inlined_call_operand.hbm [shape: f32[2,4,256], index: 0, kind: input, shape index: {}]   ;;  %s1211_s1 = inlined_call_operand.hbm [shape: s32[2,1,256], index: 1, kind: input, shape index: {}]   ;;  %s1212_s2 = inlined_call_operand.hbm [shape: f32[2,1,1,256], index: 2, kind: output, shape index: {0}]   ;;  %s1213_s3 = inlined_call_operand.hbm [shape: f32[2,1,1,256], index: 3, kind: output, shape index: {1}]  }
   0x1   :  { %11 = vsyncpa [#allocation4 + $0x1], 0 }
   0x2   :  { %12 = vsyncpa [#allocation7], 0 }
   0x3   :  { %14 = vsyncpa [#allocation7 + $0x1], 0 }
   0x4   :  { %15 = vsyncpa [#allocation5], 0 }
   0x5   :  { %17 = vsyncpa [#allocation5 + $0x1], 0 }
   0x6   :  { %18 = vsyncpa [#allocation10], 0 }
   0x7   :  { %20 = vsyncpa [#allocation10 + $0x1], 0  ;;  %s915_s12 = smov 0   ;;  %s917_s13 = smov 0  }
   0x8   :  { %s919_s14 = smov 0   ;;  %s921_s15 = smov 0  }
   0x9   :  { %s923_s16 = smov 0   ;;  %s925_s17 = smov 0  }
   0xa LB: > { %s598_s18 = sadd.s32 4294967295, %s886_s17   ;;  %s599_s19 = sadd.s32 4294967294, %s886_s17   ;;  %s886_s17 = sphi %s925_s17, %s26_s17   ;;  %s882_s16 = sphi %s923_s16, %s1235_s16   ;;  %s878_s15 = sphi %s921_s15, %s1234_s15   ;;  %s874_s14 = sphi %s919_s14, %s1233_s14   ;;  %s870_s13 = sphi %s917_s13, %s1232_s13   ;;  %s866_s12 = sphi %s915_s12, %s1231_s12  }
   0xb   : > { %s45_s20 = sadd.s32 1, %s882_s16  ;;  %s56_s21 = sadd.s32 1, %s874_s14 }
   0xc   : > { %p47_p0 = scmp.ge.s32.totalorder %s45_s20, 2  ;;  %p63_p1 = scmp.ne.s32.totalorder %s874_s14, %s870_s13 }
   0xd   : > { %p64_p2 = scmp.eq.s32.totalorder %s886_s17, 0  ;;  %p69_p3 = scmp.ne.s32.totalorder %s870_s13, %s866_s12 }
   0xe   : > { %s1237_s20 = smov (%p47_p0, %s45_s20), 0  ;;  %p70_p5 = scmp.eq.s32.totalorder %s598_s18, 0 }
   0xf   : > { %p956_p4 = por %p64_p2, %p63_p1  ;;  %s51_s23 = ssub.s32 %s882_s16, %s1237_s20 }
  0x10   : > { %p125_p6 = scmp.eq.s32.totalorder %s598_s18, 1  ;;  %p54_p7 = scmp.eq.s32.totalorder %s51_s23, 0 }
  0x11   : > { %p962_p8 = por %p70_p5, %p69_p3  ;;  %p131_p10 = scmp.eq.s32.totalorder %s599_s19, 1 }
  0x12   : > { %p966_p9 = por %p125_p6, %p63_p1  ;;  %p648_p13 = scmp.lt.s32.totalorder %s886_s17, 2 }
  0x13   : > { %s1217_s24 = scalar_select %p962_p8, 1, 0 }
  0x14   : > { %s1218_s25 = scalar_select %p966_p9, 1, 0 }
  0x15   : > { %s971_s26 = scalar_select %p54_p7, %s874_s14, %s56_s21  }
  0x16   : > { %p973_p11 = por %p131_p10, %p69_p3  ;;  %s980_s28 = sand.u32 1, %s874_s14  }
  0x17   : > { %s602_s29 = sshll.u32 %s980_s28, 3  ;;  %s622_s30 = sshll.u32 %s882_s16, 7 }
  0x18   : > { %s1219_s27 = scalar_select %p973_p11, 1, 0 }
  0x19   : > { %s987_s6 = scalar_lea.hbm %s1210_s0, %s622_s30  ;;  %s183_s7 = scalar_lea.vmem [#allocation3], %s602_s29 }
  0x1a   : > { %s194_s8 = sshll.u32 %s183_s7, 4  ;;  %p993_p0 = pnand %p648_p13, %p956_p4  ;;  %s989_s8 = int_to_ptr.vmem [resolvable:$true] %s194_s8 }
  0x1b   : > { %s180_s10 = scalar_lea.sflag [#allocation4], %s980_s28  ;;  %s708_s11 = scalar_lea.hbm %s987_s6, 128 }
  0x1c   : > { %p709_p3 = scmp.ne.s32.totalorder %s987_s6, %s708_s11  ;;  %p710_p5 = pneg %p993_p0 }
  0x1d   : > { %s713_s21 = scalar_lea.hbm %s1210_s0, 256  ;;  %p714_p4 = scmp.lt.u32.totalorder %s987_s6, %s1210_s0 }
  0x1e   : > { %p711_p6 = pnand %p710_p5, %p709_p3  ;;  %p715_p10 = scmp.lt.u32.totalorder %s713_s21, %s708_s11 }
  0x1f   : > { %p717_p12 = scmp.lt.u32.totalorder %s708_s11, %s987_s6 }
  0x20   : > { %p712_p7 = pneg %p711_p6  ;;  %p716_p13 = por %p715_p10, %p714_p4 }
  0x22   : > { %p718_p1 = por %p717_p12, %p716_p13 }
  0x24   : > { %p719_p2 = pnand %p718_p1, %p712_p7 }
  0x26   : > { %722 = shalt.err (!%p719_p2)
}
  0x27   : > { %s723_s29 = scalar_lea.vmem %s989_s8, 128  ;;  %s888_s30 = smov [#allocation3]  }
  0x28   : > { %p724_p3 = scmp.ne.s32.totalorder %s989_s8, %s723_s29  ;;  %s728_s4 = sshll.u32 %s888_s30, 4  ;;  %s729_s4 = int_to_ptr.vmem [resolvable:$false] %s728_s4 }
  0x29   : > { %s730_s5 = scalar_lea.vmem %s729_s4, 256  ;;  %p731_p9 = scmp.lt.s32.totalorder %s989_s8, %s729_s4 }
  0x2a   : > { %p726_p6 = pnand %p724_p3, %p710_p5  ;;  %p732_p4 = scmp.lt.s32.totalorder %s730_s5, %s723_s29 }
  0x2c   : > { %p727_p11 = pneg %p726_p6  ;;  %p733_p10 = por %p732_p4, %p731_p9 }
  0x2e   : > { %p734_p12 = pnand %p733_p10, %p727_p11 }
  0x30   : > { %737 = shalt.err (!%p734_p12)
}
  0x31   : > { %637 = dma.hbm_to_vmem [thread:$0]  (!%p993_p0), %s987_s6, 128, %s989_s8, %s180_s10  }
  0x32   : > { %p1221_p1 = scmp.lt.s32.totalorder %s886_s17, 3  ;;  %p1222_p2 = scmp.ge.s32.totalorder %s886_s17, 1 }
  0x33   : > { %s605_s11 = sshll.u32 %s980_s28, 1  ;;  %s623_s18 = sshll.u32 %s882_s16, 5 }
  0x34   : > { %p1029_p7 = pnand %p1222_p2, %p1221_p1  ;;  %s1038_s22 = scalar_lea.hbm %s1211_s1, %s623_s18 }
  0x35   : > { %s205_s23 = scalar_lea.vmem [#allocation6], %s605_s11  ;;  %s202_s6 = scalar_lea.sflag [#allocation7], %s980_s28 }
  0x36   : > { %s1223_s7 = scalar_select %p1029_p7, 1, 0 }
  0x37   : > { %s216_s29 = sshll.u32 %s205_s23, 4  ;;  %s738_s8 = scalar_lea.hbm %s1038_s22, 32  ;;  %s217_s29 = int_to_ptr.vmem [resolvable:$true] %s216_s29 }
  0x38   : > { %p739_p9 = scmp.ne.s32.totalorder %s1038_s22, %s738_s8  ;;  %s743_s4 = scalar_lea.hbm %s1211_s1, 64 }
  0x39   : > { %p744_p3 = scmp.lt.u32.totalorder %s1038_s22, %s1211_s1  ;;  %p745_p6 = scmp.lt.u32.totalorder %s743_s4, %s738_s8 }
  0x3a   : > { %p741_p11 = pnand %p739_p9, %p710_p5  ;;  %p747_p10 = scmp.lt.u32.totalorder %s738_s8, %s1038_s22 }
  0x3b   : > { %p746_p4 = por %p745_p6, %p744_p3 }
  0x3c   : > { %p742_p13 = pneg %p741_p11 }
  0x3d   : > { %p748_p12 = por %p747_p10, %p746_p4 }
  0x3f   : > { %p749_p1 = pnand %p748_p12, %p742_p13 }
  0x41   : > { %752 = shalt.err (!%p749_p1)
}
  0x42   : > { %s753_s28 = scalar_lea.vmem %s217_s29, 32  ;;  %s889_s11 = smov [#allocation6]  }
  0x43   : > { %p754_p2 = scmp.ne.s32.totalorder %s217_s29, %s753_s28  ;;  %s758_s19 = sshll.u32 %s889_s11, 4  ;;  %s759_s19 = int_to_ptr.vmem [resolvable:$false] %s758_s19 }
  0x44   : > { %s760_s21 = scalar_lea.vmem %s759_s19, 64  ;;  %p761_p8 = scmp.lt.s32.totalorder %s217_s29, %s759_s19 }
  0x45   : > { %p756_p9 = pnand %p754_p2, %p710_p5  ;;  %p762_p7 = scmp.lt.s32.totalorder %s760_s21, %s753_s28 }
  0x47   : > { %p757_p11 = pneg %p756_p9  ;;  %p763_p3 = por %p762_p7, %p761_p8 }
  0x49   : > { %p764_p6 = pnand %p763_p3, %p757_p11 }
  0x4b   : > { %767 = shalt.err (!%p764_p6)
}
  0x4c   : > { %640 = dma.hbm_to_vmem [thread:$0]  (!%p993_p0), %s1038_s22, 32, %s217_s29, %s202_s6  }
  0x4d   : > { %p1224_p13 = scmp.ne.s32.totalorder %s1223_s7, 0 }
  0x4e   : > { %s1063_s23 = sand.u32 (!%p1224_p13), 1, %s870_s13   ;;  %p1225_p5 = scmp.ne.s32.totalorder (!%p1224_p13), %s1217_s24, 0 }
  0x4f   : > { %225 = sbr.rel (%p1224_p13) target bundleno = 196 (0xc4), region = 28  ;;  %s609_s8 = sshll.u32 (!%p1224_p13), %s1063_s23, 3 }
  0x50   : > { %s228_s10 = scalar_lea.sflag (!%p1224_p13), [#allocation4], %s1063_s23  ;;  %s231_s30 = scalar_lea.vmem (!%p1224_p13), [#allocation3], %s609_s8 }
  0x56   : > { %849 = dma.done.wait (%p1225_p5), %s228_s10, 128  }
  0x57   : > { %851 = vsyncadd (%p1225_p5), %s228_s10, 4294967168  ;;  %s610_s9 = sshll.u32 %s1063_s23, 1  ;;  %s237_s7 = scalar_lea.sflag [#allocation7], %s1063_s23 }
  0x58   : > { %s240_s22 = scalar_lea.vmem [#allocation6], %s610_s9 }
  0x59   : > { %853 = dma.done.wait (%p1225_p5), %s237_s7, 32  }
  0x5a   : > { %855 = vsyncadd (%p1225_p5), %s237_s7, 4294967264  ;;  %v281_v0 = vlaneseq  ;;  %s1081_s29 = scalar_lea.vmem [#allocation8], %s610_s9  ;;  %v890_v2 = vmov 0.0   ;;  %s272_s6 = scalar_lea.vmem [#allocation9], %s610_s9  ;;  %vm302_vm1 = vcmask 1043456   ;;  %v1088_v3 = vld [vmem:[%s231_s30] sm:$0xff] }
  0x5b   : > { %v1090_v4 = vld [vmem:[%s240_s22] sm:$0x3]  ;;  %v300_v5 = vcombine.high %v1088_v3, %v1088_v3  ;;  %v303_v6 = vsel %vm302_vm1, %v1088_v3, -inf  ;;  %s624_s24 = sshll.u32 %s878_s15, 5  ;;  %s448_s4 = sshll.u32 %s272_s6, 4  ;;  %s1108_s4 = int_to_ptr.vmem [resolvable:$true] %s448_s4 }
  0x5c   : > { %vm1077_vm0 = vcmp.lt.s32.totalorder %v281_v0, 256  ;;  %v304_v7 = vrot.slane %v303_v6, 4  ;;  %vm376_vm2 = vcmp.ne.s32.totalorder %v1090_v4, 4294967196  ;;  %s1106_s28 = scalar_lea.hbm %s1213_s3, %s624_s24  ;;  %s416_s11 = scalar_lea.sflag [#allocation10], %s1063_s23 }
  0x5d   : > { %285 = vst.msk [vmem:[%s1081_s29] sm:$0x3] %vm1077_vm0, %v890_v2  ;;  %286 = vst.msk [vmem:[%s272_s6] sm:$0x3] %vm1077_vm0, %v890_v2  ;;  %v310_v8 = vsel %vm302_vm1, %v300_v5, -inf  ;;  %v613_v9 = vsel %vm376_vm2, 1.0, %v890_v2 }
  0x5e   : > { %v305_v11 = vmax.f32 %v303_v6, %v304_v7  ;;  %v311_v12 = vrot.slane %v310_v8, 4  ;;  %s768_s19 = scalar_lea.vmem %s1108_s4, 32  ;;  %p1228_p0 = scmp.ne.s32.totalorder %s1218_s25, 0 }
  0x5f   : > { %p769_p8 = scmp.ne.s32.totalorder %s1108_s4, %s768_s19  ;;  %s891_s21 = smov [#allocation9]  }
  0x60   : > { %v306_v14 = vrot.slane %v305_v11, 2  ;;  %v312_v15 = vmax.f32 %v310_v8, %v311_v12  ;;  %s772_s8 = sshll.u32 %s891_s21, 4  ;;  %s773_s8 = int_to_ptr.vmem [resolvable:$false] %s772_s8 }
  0x61   : > { %p770_p7 = pnand %p769_p8, %p1228_p0  ;;  %s774_s10 = scalar_lea.vmem %s773_s8, 64 }
  0x62   : > { %p775_p10 = scmp.lt.s32.totalorder %s1108_s4, %s773_s8  ;;  %p776_p12 = scmp.lt.s32.totalorder %s774_s10, %s768_s19 }
  0x63   : > { %p771_p4 = pneg %p770_p7 }
  0x64   : > { %v405_v10 = vld [vmem:[%s272_s6] sm:$0x3]  ;;  %p777_p1 = por %p776_p12, %p775_p10 }
  0x65   : > { %v408_v13 = vadd.f32 %v613_v9, %v405_v10 }
  0x66   : > { %p778_p2 = pnand %p777_p1, %p771_p4 }
  0x67   : > { %409 = vst.msk [vmem:[%s272_s6] sm:$0x3] %vm1077_vm0, %v408_v13 }
  0x68   : > { %781 = shalt.err (!%p778_p2)
}
  0x69   : > { %s782_s30 = scalar_lea.hbm %s1106_s28, 32  ;;  %s786_s22 = scalar_lea.hbm %s1213_s3, 64 }
  0x6a   : > { %p783_p9 = scmp.ne.s32.totalorder %s1106_s28, %s782_s30  ;;  %p787_p6 = scmp.lt.u32.totalorder %s1106_s28, %s1213_s3 }
  0x6b   : > { %p788_p13 = scmp.lt.u32.totalorder %s786_s22, %s782_s30  ;;  %p790_p8 = scmp.lt.u32.totalorder %s782_s30, %s1106_s28 }
  0x6c   : > { %p784_p11 = pnand %p783_p9, %p1228_p0 }
  0x6d   : > { %p789_p5 = por %p788_p13, %p787_p6 }
  0x6e   : > { %p785_p3 = pneg %p784_p11 }
  0x6f   : > { %p791_p7 = por %p790_p8, %p789_p5 }
  0x71   : > { %p792_p4 = pnand %p791_p7, %p785_p3 }
  0x73   : > { %795 = shalt.err (!%p792_p4)
}
  0x74   : > { %631 = dma.vmem_to_hbm [thread:$0]  (%p1228_p0), %s1108_s4, 32, %s1106_s28, %s416_s11   ;;  %v307_v16 = vmax.f32 %v305_v11, %v306_v14  ;;  %v313_v17 = vrot.slane %v312_v15, 2  ;;  %v1134_v18 = vshrl.u32 %v281_v0, 7  ;;  %v892_v19 = vmov 839922192  }
  0x75   : > { %v290_v20 = vunpack.c.l.s4 %v892_v19  ;;  %v893_v5 = vmov 1966171168   ;;  %s432_s4 = sshll.u32 %s1081_s29, 4  ;;  %s1158_s11 = scalar_lea.hbm %s1212_s2, %s624_s24  ;;  %s1160_s4 = int_to_ptr.vmem [resolvable:$true] %s432_s4 }
  0x76   : > { %v308_v21 = vrot.slane %v307_v16, 1  ;;  %v314_v22 = vmax.f32 %v312_v15, %v313_v17  ;;  %v320_v27 = vsub.s32 0, %v1134_v18  ;;  %v324_v28 = vsub.s32 1, %v1134_v18  ;;  %s411_s19 = scalar_lea.sflag [#allocation5], %s1063_s23  ;;  %s796_s21 = scalar_lea.vmem %s1160_s4, 32 }
  0x77   : > { %v291_v25 = vunpack.c.0.s8 %v290_v20  ;;  %v383_v6 = vunpack.c.l.s4 %v893_v5  ;;  %p797_p10 = scmp.ne.s32.totalorder %s1160_s4, %s796_s21  ;;  %s894_s15 = smov [#allocation8]  }
  0x78   : > { %v309_v23 = vmax.f32 %v307_v16, %v308_v21  ;;  %v315_v24 = vrot.slane %v314_v22, 1  ;;  %v321_v31 = vrot.slane %v1090_v4, %v320_v27  ;;  %v325_v32 = vrot.slane %v1090_v4, %v324_v28  ;;  %s800_s8 = sshll.u32 %s894_s15, 4  ;;  %s801_s8 = int_to_ptr.vmem [resolvable:$false] %s800_s8 }
  0x79   : > { %v294_v30 = vsub.s32 %v291_v25, %v1134_v18  ;;  %v384_v14 = vunpack.c.0.s8 %v383_v6  ;;  %p798_p12 = pnand %p797_p10, %p1228_p0  ;;  %s802_s10 = scalar_lea.vmem %s801_s8, 64 }
  0x7a   : > { %v316_v26 = vmax.f32 %v314_v22, %v315_v24  ;;  %v326_v36 = vcombine.low %v321_v31, %v325_v32  ;;  %v398_v24 = vld [vmem:[%s1081_s29] sm:$0x3]  ;;  %p803_p2 = scmp.lt.s32.totalorder %s1160_s4, %s801_s8  ;;  %p804_p9 = scmp.lt.s32.totalorder %s802_s10, %s796_s21 }
  0x7b   : > { %v295_v35 = vrot.slane %v1134_v18, %v294_v30  ;;  %v387_v19 = vsub.s32 %v384_v14, %v1134_v18  ;;  %p799_p1 = pneg %p798_p12 }
  0x7c   : > { %v348_v29 = vcombine.low %v309_v23, %v316_v26  ;;  %p805_p11 = por %p804_p9, %p803_p2 }
  0x7d   : > { %vm327_vm3 = vcmp.eq.s32.totalorder %v295_v35, %v326_v36 }
  0x7e   : > { %v350_v33 = vsub.f32 %v1088_v3, %v348_v29  ;;  %v328_v37 = vsel %vm327_vm3, %v1088_v3, 0.0  ;;  %p806_p3 = pnand %p805_p11, %p799_p1 }
  0x7f   : > { %v330_v39 = vcombine.high %v328_v37, %v328_v37  ;;  %v332_v42 = vsel %vm302_vm1, %v328_v37, 0.0 }
  0x80   : > { %v351_v34 = vmul.f32 1.442695, %v350_v33  ;;  %v333_v48 = vrot.slane %v332_v42, 4 }
  0x81   : > { %v339_v45 = vsel %vm302_vm1, %v330_v39, 0.0 }
  0x82   : > { %702 = vpow2.f32 %v351_v34  ;;  %v340_v51 = vrot.slane %v339_v45, 4  ;;  %v334_v54 = vadd.f32 %v333_v48, %v332_v42 }
  0x84   : > { %v341_v57 = vadd.f32 %v340_v51, %v339_v45  ;;  %v335_v60 = vrot.slane %v334_v54, 2 }
  0x86   : > { %v342_v62 = vrot.slane %v341_v57, 2  ;;  %v336_v63 = vadd.f32 %v335_v60, %v334_v54 }
  0x88   : > { %v343_v0 = vadd.f32 %v342_v62, %v341_v57  ;;  %v337_v2 = vrot.slane %v336_v63, 1 }
  0x8a   : > { %v344_v3 = vrot.slane %v343_v0, 1  ;;  %v338_v8 = vadd.f32 %v337_v2, %v336_v63 }
  0x8c   : > { %v703_v38 = vpop.eup %702  ;;  %v345_v11 = vadd.f32 %v344_v3, %v343_v0 }
  0x8d   : > { %v354_v40 = vcombine.high %v703_v38, %v703_v38  ;;  %v356_v41 = vsel %vm302_vm1, %v703_v38, 0.0 }
  0x8e   : > { %v357_v43 = vrot.slane %v356_v41, 4 }
  0x8f   : > { %v363_v44 = vsel %vm302_vm1, %v354_v40, 0.0 }
  0x90   : > { %v358_v46 = vadd.f32 %v357_v43, %v356_v41  ;;  %v364_v47 = vrot.slane %v363_v44, 4 }
  0x92   : > { %v359_v49 = vrot.slane %v358_v46, 2  ;;  %v365_v50 = vadd.f32 %v364_v47, %v363_v44 }
  0x94   : > { %v360_v52 = vadd.f32 %v359_v49, %v358_v46  ;;  %v366_v53 = vrot.slane %v365_v50, 2 }
  0x96   : > { %v361_v55 = vrot.slane %v360_v52, 1  ;;  %v367_v56 = vadd.f32 %v366_v53, %v365_v50 }
  0x98   : > { %v362_v58 = vadd.f32 %v361_v55, %v360_v52  ;;  %v368_v59 = vrot.slane %v367_v56, 1 }
  0x9a   : > { %v369_v61 = vadd.f32 %v368_v59, %v367_v56  ;;  %704 = vlog2.f32 %v362_v58 }
  0x9c   : > { %706 = vlog2.f32 %v369_v61 }
  0xa4   : > { %v705_v7 = vpop.eup %704 }
  0xa5   : > { %v371_v9 = vmul.f32 0.6931472, %v705_v7 }
  0xa6   : > { %v707_v10 = vpop.eup %706 }
  0xa7   : > { %v373_v12 = vmul.f32 0.6931472, %v707_v10  ;;  %v374_v13 = vadd.f32 %v371_v9, %v309_v23 }
  0xa9   : > { %v375_v15 = vadd.f32 %v373_v12, %v316_v26  ;;  %v377_v16 = vsub.f32 %v374_v13, %v338_v8 }
  0xab   : > { %v378_v17 = vsub.f32 %v375_v15, %v345_v11 }
  0xad   : > { %v381_v20 = vcombine.low %v377_v16, %v378_v17 }
  0xaf   : > { %v388_v21 = vrot.slane %v381_v20, %v387_v19 }
  0xb1   : > { %v395_v22 = vrot.slane %v388_v21, %v387_v19 }
  0xb3   : > { %v397_v25 = vsel %vm376_vm2, %v395_v22, 0.0 }
  0xb4   : > { %v399_v27 = vadd.f32 %v398_v24, %v397_v25 }
  0xb6   : > { %404 = vst.msk [vmem:[%s1081_s29] sm:$0x3] %vm1077_vm0, %v399_v27 }
  0xb7   : > { %809 = shalt.err (!%p806_p3)
}
  0xb8   : > { %s810_s23 = scalar_lea.hbm %s1158_s11, 32  ;;  %s814_s30 = scalar_lea.hbm %s1212_s2, 64 }
  0xb9   : > { %p811_p6 = scmp.ne.s32.totalorder %s1158_s11, %s810_s23  ;;  %p815_p8 = scmp.lt.u32.totalorder %s1158_s11, %s1212_s2 }
  0xba   : > { %p816_p7 = scmp.lt.u32.totalorder %s814_s30, %s810_s23  ;;  %p818_p10 = scmp.lt.u32.totalorder %s810_s23, %s1158_s11 }
  0xbb   : > { %p812_p13 = pnand %p811_p6, %p1228_p0 }
  0xbc   : > { %p817_p4 = por %p816_p7, %p815_p8 }
  0xbd   : > { %p813_p5 = pneg %p812_p13 }
  0xbe   : > { %p819_p12 = por %p818_p10, %p817_p4 }
  0xc0   : > { %p820_p1 = pnand %p819_p12, %p813_p5 }
  0xc2   : > { %823 = shalt.err (!%p820_p1)
}
  0xc3   : > { %630 = dma.vmem_to_hbm [thread:$0]  (%p1228_p0), %s1160_s4, 32, %s1158_s11, %s411_s19  }
  0xc4 PF: > { %s460_s22 = sand.u32 1, %s866_s12   ;;  %p1229_p2 = scmp.ne.s32.totalorder %s1219_s27, 0 }
  0xc5   : > { %p1230_p9 = scmp.ge.s32.totalorder %s886_s17, 2  ;;  %s461_s6 = scalar_lea.sflag [#allocation5], %s460_s22 }
  0xc7   : > { %p642_p11 = pnand %p1230_p9, %p1229_p2 }
  0xc9   : > { %857 = dma.done.wait (!%p642_p11), %s461_s6, 32  }
  0xca   : > { %859 = vsyncadd (!%p642_p11), %s461_s6, 4294967264  ;;  %s470_s5 = scalar_lea.sflag [#allocation10], %s460_s22 }
  0xcb   : > { %861 = dma.done.wait (!%p642_p11), %s470_s5, 32  }
  0xcc   : > { %863 = vsyncadd (!%p642_p11), %s470_s5, 4294967264  ;;  %s26_s17 = sadd.s32 1, %s886_s17   ;;  %s1231_s12 = smov %s870_s13 }
  0xcd   : > { %p23_p3 = scmp.ge.s32.totalorder %s26_s17, 4   ;;  %s1232_s13 = smov %s874_s14 }
  0xce   : > { %s1233_s14 = smov %s971_s26  ;;  %s1234_s15 = smov %s882_s16 }
  0xcf   : > { %s1235_s16 = smov %s1237_s20  ;;  %25 = sbr.rel (!%p23_p3) target bundleno = 10 (0xa), region = 107 }
  0xd6   :  { %475 = vsyncpa [#allocation4], 1 }
  0xd7   :  { %477 = vsyncpa [#allocation4 + $0x1], 1 }
  0xd8   :  { %478 = vsyncpa [#allocation7], 1 }
  0xd9   :  { %480 = vsyncpa [#allocation7 + $0x1], 1 }
  0xda   :  { %481 = vsyncpa [#allocation5], 1 }
  0xdb   :  { %483 = vsyncpa [#allocation5 + $0x1], 1 }
  0xdc   :  { %484 = vsyncpa [#allocation10], 1 }
  0xdd   :  { %486 = vsyncpa [#allocation10 + $0x1], 1 }

</bundles_post_ra>
